<compile_context>
chip_gen: v7x
topology: tpu7x:2x2x1
jax: 0.10.0
libtpu: 0.0.40
codegen_flags: <defaults>
</compile_context>

<pallas_src>
import jax
import jax.numpy as jnp
from jax.experimental import pallas as pl
from jax.experimental.pallas import tpu as pltpu


def _round_up(n, m):
    return ((n + m - 1) // m) * m


def _mlp_kernel(x_ref, w1_ref, b1_ref, w2_ref, b2_ref, o_ref):
    # x_ref: (tile, P*16) f32 packed | w1: (P*16, P*16) bf16 | b1: (1, P*16) f32
    # w2: (P*16, P*8) bf16 | b2: (1, P*8) f32 | o_ref: (tile, P*8) out_dtype
    x = x_ref[...].astype(jnp.bfloat16)  # in-kernel cast, hidden under the DMA
    h = jnp.dot(x, w1_ref[...], preferred_element_type=jnp.float32) + b1_ref[...]
    h = jnp.maximum(h, 0.0)
    y = (
        jnp.dot(h.astype(w2_ref.dtype), w2_ref[...],
                preferred_element_type=jnp.float32)
        + b2_ref[...]
    )
    o_ref[...] = y.astype(o_ref.dtype)


def toy_model_forward(x, w1, b1, w2, b2, *, pack=16, tile_rows=1024,
                      out_dtype=None):
    """x: (B, 16); w1: (16, 16); b1: (1, 16); w2: (16, 8); b2: (1, 8).

    pack: batch rows packed per lane-row (16 -> K=N=256 for v6e/v7x MXU,
          8 -> K=N=128 for v5e's native 128x128 MXU; both stay mem-bound).
    """
    B, in_f = x.shape
    hidden = w1.shape[1]
    out_f = w2.shape[1]
    out_dtype = out_dtype or x.dtype

    P = pack
    # Pad only to a multiple of the packing factor (<= P-1 rows), not to the tile.
    B_pad = _round_up(B, P)
    xp = jnp.pad(x, ((0, B_pad - B), (0, 0))) if B_pad != B else x
    n_rows = B_pad // P
    x_packed = xp.reshape(n_rows, P * in_f)          # contiguous reshape, free

    # Tiny block-diagonal weights / tiled biases (negligible vs. x HBM traffic).
    eye = jnp.eye(P, dtype=w1.dtype)
    w1_bd = jnp.kron(eye, w1).astype(jnp.bfloat16)   # (P*in, P*hidden)
    w2_bd = jnp.kron(eye, w2).astype(jnp.bfloat16)   # (P*hidden, P*out)
    b1_t = jnp.tile(b1.reshape(1, hidden).astype(jnp.float32), (1, P))
    b2_t = jnp.tile(b2.reshape(1, out_f).astype(jnp.float32), (1, P))

    K1 = P * in_f      # 256 (pack=16)
    H = P * hidden     # 256
    N = P * out_f      # 128  -> lane-dense output block

    # Tile: multiple of 8 packed rows, aim for >=8 grid steps (v7x megacore),
    # capped at tile_rows (1024 packed rows = 1 MiB f32 x-block per DMA).
    if n_rows <= 8:
        tile = n_rows                       # single block == full array dim
    else:
        tile = max(8, min(tile_rows, _round_up(pl.cdiv(n_rows, 8), 8)))
    grid = (pl.cdiv(n_rows, tile),)         # ragged tail -> partial edge block

    out_packed = pl.pallas_call(
        _mlp_kernel,
        out_shape=jax.ShapeDtypeStruct((n_rows, N), out_dtype),
        grid_spec=pltpu.PrefetchScalarGridSpec(
            num_scalar_prefetch=0,
            grid=grid,
            in_specs=[
                pl.BlockSpec((tile, K1), lambda i: (i, 0)),  # packed x tile
                pl.BlockSpec((K1, H), lambda i: (0, 0)),     # W1_bd (resident)
                pl.BlockSpec((1, H), lambda i: (0, 0)),      # b1 (resident)
                pl.BlockSpec((H, N), lambda i: (0, 0)),      # W2_bd (resident)
                pl.BlockSpec((1, N), lambda i: (0, 0)),      # b2 (resident)
            ],
            out_specs=pl.BlockSpec((tile, N), lambda i: (i, 0)),
        ),
        compiler_params=pltpu.CompilerParams(
            dimension_semantics=("parallel",),
            vmem_limit_bytes=32 << 20,      # ~6 MiB used/step at tile_rows=1024
        ),
    )(x_packed, w1_bd, b1_t, w2_bd, b2_t)

    # (n_rows, P*out) -> (B_pad, out): row i column-block g is original row i*P+g.
    out = out_packed.reshape(B_pad, out_f)
    return out[:B] if B_pad != B else out


def init_params(key):
    # Deterministic synthetic init (shapes from ToyModel.__init__).
    k1, k2, k3, k4 = jax.random.split(key, 4)
    w1 = jax.random.normal(k1, (16, 16), jnp.float32) * 0.1   # (in, out)
    b1 = jax.random.normal(k2, (1, 16), jnp.float32) * 0.1
    w2 = jax.random.normal(k3, (16, 8), jnp.float32) * 0.1    # (in, out)
    b2 = jax.random.normal(k4, (1, 8), jnp.float32) * 0.1
    return w1, b1, w2, b2


if __name__ == "__main__":
    key = jax.random.PRNGKey(0)
    kx, kp = jax.random.split(key)
    w1, b1, w2, b2 = init_params(kp)

    def ref_bf16(xv):
        # Mirrors the kernel's mixed precision (bf16 matmul inputs, f32 acc).
        xb = xv.astype(jnp.bfloat16)
        h = jnp.dot(xb, w1.astype(jnp.bfloat16),
                    preferred_element_type=jnp.float32) + b1
        h = jnp.maximum(h, 0.0)
        return jnp.dot(h.astype(jnp.bfloat16), w2.astype(jnp.bfloat16),
                       preferred_element_type=jnp.float32) + b2

    # Small case: B=8 (single packed block).
    x = jax.random.normal(kx, (8, 16), jnp.float32)
    out = jax.block_until_ready(toy_model_forward(x, w1, b1, w2, b2))
    assert out.shape == (8, 8)
    assert jnp.allclose(out, ref_bf16(x), atol=1e-4, rtol=1e-3)
    ref_f32 = jnp.maximum(x @ w1 + b1, 0.0) @ w2 + b2
    assert jnp.allclose(out, ref_f32, atol=5e-2, rtol=5e-2)

    # Ragged case: B=200 -> multiple grid steps + a partial edge block.
    x2 = jax.random.normal(kx, (200, 16), jnp.float32)
    out2 = jax.block_until_ready(toy_model_forward(x2, w1, b1, w2, b2))
    assert out2.shape == (200, 8)
    assert jnp.allclose(out2, ref_bf16(x2), atol=1e-4, rtol=1e-3)

    print("KERNEL_OK")
</pallas_src>

<mosaic_0001>
module attributes {stable_mosaic.version = 11 : i64} {
  func.func @_mlp_kernel(%arg0: i32, %arg1: memref<1x256xf32, #tpu.memory_space<vmem>>, %arg2: memref<256x256xbf16, #tpu.memory_space<vmem>>, %arg3: memref<1x256xf32, #tpu.memory_space<vmem>>, %arg4: memref<256x128xbf16, #tpu.memory_space<vmem>>, %arg5: memref<1x128xf32, #tpu.memory_space<vmem>>, %arg6: memref<1x128xf32, #tpu.memory_space<vmem>>) attributes {dimension_semantics = [#tpu.dimension_semantics<parallel>], iteration_bounds = array<i64: 1>, scalar_prefetch = 0 : i64, scratch_operands = 0 : i64, tpu.core_type = #tpu.core_type<tc>, window_params = [{transform_indices = @transform_0, window_bounds = array<i64: 1, 256>}, {pipeline_mode = #tpu.pipeline_mode<synchronous>, transform_indices = @transform_1, window_bounds = array<i64: 256, 256>}, {pipeline_mode = #tpu.pipeline_mode<synchronous>, transform_indices = @transform_2, window_bounds = array<i64: 1, 256>}, {pipeline_mode = #tpu.pipeline_mode<synchronous>, transform_indices = @transform_3, window_bounds = array<i64: 256, 128>}, {pipeline_mode = #tpu.pipeline_mode<synchronous>, transform_indices = @transform_4, window_bounds = array<i64: 1, 128>}, {transform_indices = @transform_5, window_bounds = array<i64: 1, 128>}]} {
    %c0 = arith.constant 0 : index
    %c0_0 = arith.constant 0 : index
    %0 = vector.load %arg1[%c0, %c0_0] : memref<1x256xf32, #tpu.memory_space<vmem>>, vector<1x256xf32>
    %1 = arith.truncf %0 : vector<1x256xf32> to vector<1x256xbf16>
    %c0_1 = arith.constant 0 : index
    %c0_2 = arith.constant 0 : index
    %2 = vector.load %arg2[%c0_1, %c0_2] : memref<256x256xbf16, #tpu.memory_space<vmem>>, vector<256x256xbf16>
    %cst = arith.constant dense<0.000000e+00> : vector<1x256xf32>
    %3 = tpu.matmul %1, %2, %cst {dimension_numbers = #tpu.dot_dimension_numbers<[1], [0], [0], [1], [0, 0, 1, 1], [], []>} : vector<1x256xbf16>, vector<256x256xbf16>, vector<1x256xf32> -> vector<1x256xf32>
    %c0_3 = arith.constant 0 : index
    %c0_4 = arith.constant 0 : index
    %4 = vector.load %arg3[%c0_3, %c0_4] : memref<1x256xf32, #tpu.memory_space<vmem>>, vector<1x256xf32>
    %5 = arith.addf %3, %4 : vector<1x256xf32>
    %cst_5 = arith.constant 0.000000e+00 : f32
    %6 = vector.broadcast %cst_5 : f32 to vector<1x256xf32>
    %7 = arith.maximumf %5, %6 : vector<1x256xf32>
    %8 = arith.truncf %7 : vector<1x256xf32> to vector<1x256xbf16>
    %c0_6 = arith.constant 0 : index
    %c0_7 = arith.constant 0 : index
    %9 = vector.load %arg4[%c0_6, %c0_7] : memref<256x128xbf16, #tpu.memory_space<vmem>>, vector<256x128xbf16>
    %cst_8 = arith.constant dense<0.000000e+00> : vector<1x128xf32>
    %10 = tpu.matmul %8, %9, %cst_8 {dimension_numbers = #tpu.dot_dimension_numbers<[1], [0], [0], [1], [0, 0, 1, 1], [], []>} : vector<1x256xbf16>, vector<256x128xbf16>, vector<1x128xf32> -> vector<1x128xf32>
    %c0_9 = arith.constant 0 : index
    %c0_10 = arith.constant 0 : index
    %11 = vector.load %arg5[%c0_9, %c0_10] : memref<1x128xf32, #tpu.memory_space<vmem>>, vector<1x128xf32>
    %12 = arith.addf %10, %11 : vector<1x128xf32>
    %c0_11 = arith.constant 0 : index
    %c0_12 = arith.constant 0 : index
    %13 = vector.load %arg6[%c0_11, %c0_12] : memref<1x128xf32, #tpu.memory_space<vmem>>, vector<1x128xf32>
    tpu.vector_store %arg6[%c0_11, %c0_12], %12 {strides = array<i32>} : memref<1x128xf32, #tpu.memory_space<vmem>>, vector<1x128xf32>,
    return
  }
  func.func @transform_0(%arg0: i32) -> (i32, i32) {
    %c0_i32 = arith.constant 0 : i32
    %c0_i32_0 = arith.constant 0 : i32
    return %arg0, %c0_i32 : i32, i32
  }
  func.func @transform_1(%arg0: i32) -> (i32, i32) {
    %c0_i32 = arith.constant 0 : i32
    %c0_i32_0 = arith.constant 0 : i32
    %c0_i32_1 = arith.constant 0 : i32
    return %c0_i32, %c0_i32_0 : i32, i32
  }
  func.func @transform_2(%arg0: i32) -> (i32, i32) {
    %c0_i32 = arith.constant 0 : i32
    %c0_i32_0 = arith.constant 0 : i32
    %c0_i32_1 = arith.constant 0 : i32
    return %c0_i32, %c0_i32_0 : i32, i32
  }
  func.func @transform_3(%arg0: i32) -> (i32, i32) {
    %c0_i32 = arith.constant 0 : i32
    %c0_i32_0 = arith.constant 0 : i32
    %c0_i32_1 = arith.constant 0 : i32
    return %c0_i32, %c0_i32_0 : i32, i32
  }
  func.func @transform_4(%arg0: i32) -> (i32, i32) {
    %c0_i32 = arith.constant 0 : i32
    %c0_i32_0 = arith.constant 0 : i32
    %c0_i32_1 = arith.constant 0 : i32
    return %c0_i32, %c0_i32_0 : i32, i32
  }
  func.func @transform_5(%arg0: i32) -> (i32, i32) {
    %c0_i32 = arith.constant 0 : i32
    %c0_i32_0 = arith.constant 0 : i32
    return %arg0, %c0_i32 : i32, i32
  }
}

</mosaic_0001>

<bundles_post_ra>
// kernel: tpu_custom_call.1
= control target key start
LH: loop header
LB: loop body
LE: loop exit
PB: predicated region body
PF: predicated region fallthrough
CT: control target
= control target key end

     0   :  { %10 = vsyncpa [#allocation3], 0  ;;  %s850_s0 = inlined_call_operand.hbm [shape: f32[1,256], index: 0, kind: input, shape index: {}]   ;;  %s851_s1 = inlined_call_operand.hbm [shape: bf16[256,256], index: 1, kind: input, shape index: {}]   ;;  %s852_s2 = inlined_call_operand.vmem [shape: f32[1,256], index: 2, kind: input, shape index: {}]   ;;  %s853_s3 = inlined_call_operand.hbm [shape: bf16[256,128], index: 3, kind: input, shape index: {}]   ;;  %s854_s4 = inlined_call_operand.vmem [shape: f32[1,128], index: 4, kind: input, shape index: {}]   ;;  %s855_s5 = inlined_call_operand.hbm [shape: f32[1,128], index: 5, kind: output, shape index: {}]  }
   0x1   :  { %11 = vsyncpa [#allocation6], 0 }
   0x2   :  { %12 = vsyncpa [#allocation4], 0  ;;  %s746_s18 = smov [#allocation5]   ;;  %s652_s22 = scalar_lea.hbm %s851_s1, 4096 }
   0x3   :  { %s28_s19 = sshll.u32 %s746_s18, 4  ;;  %p653_p0 = scmp.ne.s32.totalorder %s851_s1, %s652_s22  ;;  %s29_s19 = int_to_ptr.vmem [resolvable:$true] %s28_s19 }
   0x4   :  { %p656_p1 = scmp.lt.u32.totalorder %s652_s22, %s851_s1 }
   0x6   :  { %p658_p2 = pnand %p656_p1, %p653_p0 }
   0x8   :  { %661 = shalt.err (!%p658_p2)
}
   0x9   :  { %s662_s27 = scalar_lea.vmem %s29_s19, 4096  ;;  %p667_p4 = scmp.lt.s32.totalorder %s29_s19, %s29_s19 }
   0xa   :  { %p663_p3 = scmp.ne.s32.totalorder %s29_s19, %s662_s27  ;;  %p668_p5 = scmp.lt.s32.totalorder %s662_s27, %s662_s27 }
   0xc   :  { %p669_p6 = por %p668_p5, %p667_p4 }
   0xe   :  { %p670_p7 = pnand %p669_p6, %p663_p3 }
  0x10   :  { %673 = shalt.err (!%p670_p7)
}
  0x11   :  { %s747_s28 = smov 128   ;;  %s748_s29 = smov 8  }
  0x12   :  { %34 = dma.hbm_to_vmem [thread:$0]  %s851_s1, 4096, %s29_s19, [#allocation6], %s747_s28, %s747_s28, %s748_s29  }
  0x13   :  { %s749_s7 = smov [#allocation2]   ;;  %s750_s9 = smov [#allocation7]  }
  0x14   :  { %s19_s8 = sshll.u32 %s749_s7, 4  ;;  %s42_s10 = sshll.u32 %s750_s9, 4  ;;  %s20_s8 = int_to_ptr.vmem [resolvable:$true] %s19_s8  ;;  %s43_s10 = int_to_ptr.vmem [resolvable:$true] %s42_s10 }
  0x15   :  { %s674_s13 = scalar_lea.hbm %s850_s0, 32 }
  0x16   :  { %p675_p8 = scmp.ne.s32.totalorder %s850_s0, %s674_s13  ;;  %p678_p9 = scmp.lt.u32.totalorder %s674_s13, %s850_s0 }
  0x18   :  { %p680_p10 = pnand %p678_p9, %p675_p8 }
  0x1a   :  { %683 = shalt.err (!%p680_p10)
}
  0x1b   :  { %s684_s1 = scalar_lea.vmem %s20_s8, 32  ;;  %p689_p12 = scmp.lt.s32.totalorder %s20_s8, %s20_s8 }
  0x1c   :  { %p685_p11 = scmp.ne.s32.totalorder %s20_s8, %s684_s1  ;;  %p690_p13 = scmp.lt.s32.totalorder %s684_s1, %s684_s1 }
  0x1e   :  { %p691_p0 = por %p690_p13, %p689_p12 }
  0x20   :  { %p692_p1 = pnand %p691_p0, %p685_p11 }
  0x22   :  { %695 = shalt.err (!%p692_p1)
}
  0x23   :  { %22 = dma.hbm_to_vmem [thread:$0]  %s850_s0, 32, %s20_s8, [#allocation3]  }
  0x24   :  { %s696_s22 = scalar_lea.hbm %s853_s3, 2048 }
  0x25   :  { %p697_p2 = scmp.ne.s32.totalorder %s853_s3, %s696_s22  ;;  %p700_p3 = scmp.lt.u32.totalorder %s696_s22, %s853_s3 }
  0x27   :  { %p702_p4 = pnand %p700_p3, %p697_p2 }
  0x29   :  { %705 = shalt.err (!%p702_p4)
}
  0x2a   :  { %s706_s27 = scalar_lea.vmem %s43_s10, 2048  ;;  %p711_p6 = scmp.lt.s32.totalorder %s43_s10, %s43_s10 }
  0x2b   :  { %p707_p5 = scmp.ne.s32.totalorder %s43_s10, %s706_s27  ;;  %p712_p7 = scmp.lt.s32.totalorder %s706_s27, %s706_s27 }
  0x2d   :  { %p713_p8 = por %p712_p7, %p711_p6 }
  0x2f   :  { %p714_p9 = pnand %p713_p8, %p707_p5 }
  0x31   :  { %717 = shalt.err (!%p714_p9)
}
  0x32   :  { %s751_s0 = smov 64   ;;  %s752_s28 = smov 4  }
  0x33   :  { %48 = dma.hbm_to_vmem [thread:$0]  %s853_s3, 2048, %s43_s10, [#allocation6], %s751_s0, %s751_s0, %s752_s28  }
  0x34   :  { %740 = dma.done.wait [#allocation3], 32  }
  0x35   :  { %741 = vsyncadd [#allocation3], 4294967264 }
  0x36   :  { %742 = dma.done.wait [#allocation6], 6144  }
  0x37   :  { %743 = vsyncadd [#allocation6], 4294961152  ;;  %v588_v0 = vld [vmem:[#allocation5 + $0x4] ss:$8 sps:$4 sm:$0xff]   ;;  %v590_v1 = vld [vmem:[#allocation5] ss:$8 sps:$4 sm:$0xff]   ;;  %v63_v7 = vlaneseq }
  0x38   :  { %279 = vmatprep.subr.bf16.mxu0 %v588_v0  ;;  %v591_v2 = vld [vmem:[#allocation5 + $0x14] ss:$8 sps:$4 sm:$0xff]   ;;  %v593_v3 = vld [vmem:[#allocation5 + $0x10] ss:$8 sps:$4 sm:$0xff]   ;;  %v594_v4 = vld [vmem:[#allocation5 + $0x24] ss:$8 sps:$4 sm:$0xff]  }
  0x39   :  { %280 = vmatpush1.bf16.msra.mxu0 %v590_v1  ;;  %v596_v5 = vld [vmem:[#allocation5 + $0x20] ss:$8 sps:$4 sm:$0xff]   ;;  %v597_v6 = vld [vmem:[#allocation5 + $0x34] ss:$8 sps:$4 sm:$0xff]   ;;  %v599_v8 = vld [vmem:[#allocation5 + $0x30] ss:$8 sps:$4 sm:$0xff]  }
  0x3a   :  { %281 = vmatprep.subr.bf16.mxu0 %v591_v2  ;;  %v600_v9 = vld [vmem:[#allocation5 + $0x44] ss:$8 sps:$4 sm:$0xff]   ;;  %v820_v10 = vshrl.u32 %v63_v7, 7  ;;  %v602_v11 = vld [vmem:[#allocation5 + $0x40] ss:$8 sps:$4 sm:$0xff]   ;;  %v640_v25 = vld [vmem:[#allocation7 + $0x50] sm:$0xff]  }
  0x3b   :  { %v603_v12 = vld [vmem:[#allocation5 + $0x54] ss:$8 sps:$4 sm:$0xff]   ;;  %v605_v14 = vld [vmem:[#allocation5 + $0x50] ss:$8 sps:$4 sm:$0xff]   ;;  %v606_v15 = vld [vmem:[#allocation5 + $0x64] ss:$8 sps:$4 sm:$0xff]  }
  0x3c   :  { %v69_v13 = vsub.s32 1, %v820_v10  ;;  %v608_v16 = vld [vmem:[#allocation5 + $0x60] ss:$8 sps:$4 sm:$0xff]   ;;  %v823_v17 = vld [vmem:[#allocation2] sm:$0x3]  ;;  %v641_v28 = vld [vmem:[#allocation7 + $0x10] sm:$0xff]  }
  0x3d   :  { %282 = vmatpush1.bf16.msra.mxu0 %v593_v3  ;;  %v609_v18 = vld [vmem:[#allocation5 + $0x74] ss:$8 sps:$4 sm:$0xff]   ;;  %v636_v20 = vld [vmem:[#allocation7 + $0x40] sm:$0xff]   ;;  %v638_v23 = vld [vmem:[#allocation7 + $0x48] sm:$0xff]   ;;  %v65_v47 = vsub.s32 0, %v820_v10 }
  0x3e   :  { %283 = vmatprep.subr.bf16.mxu0 %v594_v4  ;;  %v70_v19 = vrot.slane %v823_v17, %v69_v13  ;;  %v637_v21 = vld [vmem:[#allocation7] sm:$0xff]   ;;  %558 = vmatprep.subr.bf16.mxu1 %v636_v20  ;;  %v639_v24 = vld [vmem:[#allocation7 + $0x8] sm:$0xff]   ;;  %v611_v26 = vld [vmem:[#allocation5 + $0x70] ss:$8 sps:$4 sm:$0xff]  }
  0x3f   :  { %559 = vmatpush3.bf16.msra.mxu1 %v637_v21  ;;  %v612_v27 = vld [vmem:[#allocation5 + $0x84] ss:$8 sps:$4 sm:$0xff]   ;;  %v642_v29 = vld [vmem:[#allocation7 + $0x58] sm:$0xff]   ;;  %v614_v30 = vld [vmem:[#allocation5 + $0x80] ss:$8 sps:$4 sm:$0xff]   ;;  %v66_v50 = vrot.slane %v823_v17, %v65_v47 }
  0x40   :  { %v74_v22 = vpack.c.bf16 %v70_v19, %v70_v19  ;;  %560 = vmatprep.subr.bf16.mxu1 %v638_v23  ;;  %v615_v31 = vld [vmem:[#allocation5 + $0x94] ss:$8 sps:$4 sm:$0xff]   ;;  %v617_v32 = vld [vmem:[#allocation5 + $0x90] ss:$8 sps:$4 sm:$0xff]   ;;  %v644_v34 = vld [vmem:[#allocation7 + $0x60] sm:$0xff]  }
  0x41   :  { %284 = vmatpush1.bf16.msra.mxu0 %v596_v5  ;;  %v643_v33 = vld [vmem:[#allocation7 + $0x18] sm:$0xff]   ;;  %v618_v35 = vld [vmem:[#allocation5 + $0xa4] ss:$8 sps:$4 sm:$0xff]   ;;  %v620_v38 = vld [vmem:[#allocation5 + $0xa0] ss:$8 sps:$4 sm:$0xff]   ;;  %v73_v52 = vpack.c.bf16 %v66_v50, %v66_v50 }
  0x42   :  { %285 = vmatprep.subr.bf16.mxu0 %v597_v6  ;;  %311 = vmatprep.mubr.bf16.mxu0 %v74_v22  ;;  %v645_v36 = vld [vmem:[#allocation7 + $0x20] sm:$0xff]   ;;  %v646_v37 = vld [vmem:[#allocation7 + $0x68] sm:$0xff]   ;;  %v621_v39 = vld [vmem:[#allocation5 + $0xb4] ss:$8 sps:$4 sm:$0xff]  }
  0x43   :  { %561 = vmatpush3.bf16.msra.mxu1 %v639_v24  ;;  %v647_v40 = vld [vmem:[#allocation7 + $0x28] sm:$0xff]   ;;  %v623_v41 = vld [vmem:[#allocation5 + $0xb0] ss:$8 sps:$4 sm:$0xff]   ;;  %v627_v44 = vld [vmem:[#allocation5 + $0xd4] ss:$8 sps:$4 sm:$0xff]  }
  0x44   :  { %562 = vmatprep.subr.bf16.mxu1 %v640_v25  ;;  %v624_v42 = vld [vmem:[#allocation5 + $0xc4] ss:$8 sps:$4 sm:$0xff]   ;;  %v626_v43 = vld [vmem:[#allocation5 + $0xc0] ss:$8 sps:$4 sm:$0xff]   ;;  %v629_v45 = vld [vmem:[#allocation5 + $0xd0] ss:$8 sps:$4 sm:$0xff]  }
  0x45   :  { %286 = vmatpush1.bf16.msra.mxu0 %v599_v8  ;;  %v630_v46 = vld [vmem:[#allocation5 + $0xe4] ss:$8 sps:$4 sm:$0xff]   ;;  %v632_v48 = vld [vmem:[#allocation5 + $0xe0] ss:$8 sps:$4 sm:$0xff]   ;;  %v633_v49 = vld [vmem:[#allocation5 + $0xf4] ss:$8 sps:$4 sm:$0xff]  }
  0x46   :  { %287 = vmatprep.subr.bf16.mxu0 %v600_v9  ;;  %v635_v51 = vld [vmem:[#allocation5 + $0xf0] ss:$8 sps:$4 sm:$0xff]   ;;  %v107_v57 = vld [vmem:[%s852_s2] sm:$0x3]  ;;  %s753_s2 = smov [#allocation8]  }
  0x47   :  { %563 = vmatpush3.bf16.msra.mxu1 %v641_v28  ;;  %v648_v53 = vld [vmem:[#allocation7 + $0x70] sm:$0xff]   ;;  %v650_v55 = vld [vmem:[#allocation7 + $0x78] sm:$0xff]   ;;  %v272_v58 = vrot.slane %v107_v57, %v65_v47  ;;  %v276_v59 = vrot.slane %v107_v57, %v69_v13  ;;  %s500_s9 = sshll.u32 %s753_s2, 4  ;;  %s501_s9 = int_to_ptr.vmem [resolvable:$true] %s500_s9 }
  0x48   :  { %564 = vmatprep.subr.bf16.mxu1 %v642_v29  ;;  %v649_v54 = vld [vmem:[#allocation7 + $0x30] sm:$0xff]   ;;  %v651_v56 = vld [vmem:[#allocation7 + $0x38] sm:$0xff]   ;;  %s718_s10 = scalar_lea.vmem %s501_s9, 16  ;;  %s722_s11 = scalar_lea.vmem %s501_s9, 32 }
  0x49   :  { %288 = vmatpush1.bf16.msra.mxu0 %v602_v11  ;;  %v356_v7 = vld [vmem:[%s854_s4] sm:$0x1]  ;;  %p719_p10 = scmp.ne.s32.totalorder %s501_s9, %s718_s10  ;;  %p723_p11 = scmp.lt.s32.totalorder %s501_s9, %s501_s9 }
  0x4a   :  { %289 = vmatprep.subr.bf16.mxu0 %v603_v12  ;;  %p724_p12 = scmp.lt.s32.totalorder %s722_s11, %s718_s10 }
  0x4b   :  { %565 = vmatpush3.bf16.msra.mxu1 %v643_v33 }
  0x4c   :  { %566 = vmatprep.subr.bf16.mxu1 %v644_v34  ;;  %p725_p13 = por %p724_p12, %p723_p11 }
  0x4d   :  { %290 = vmatpush1.bf16.msra.mxu0 %v605_v14 }
  0x4e   :  { %291 = vmatprep.subr.bf16.mxu0 %v606_v15  ;;  %p726_p0 = pnand %p725_p13, %p719_p10 }
  0x4f   :  { %567 = vmatpush3.bf16.msra.mxu1 %v645_v36 }
  0x50   :  { %568 = vmatprep.subr.bf16.mxu1 %v646_v37 }
  0x51   :  { %292 = vmatpush1.bf16.msra.mxu0 %v608_v16 }
  0x52   :  { %293 = vmatprep.subr.bf16.mxu0 %v609_v18 }
  0x53   :  { %569 = vmatpush3.bf16.msra.mxu1 %v647_v40 }
  0x54   :  { %570 = vmatprep.subr.bf16.mxu1 %v648_v53 }
  0x55   :  { %294 = vmatpush1.bf16.msra.mxu0 %v611_v26 }
  0x56   :  { %295 = vmatprep.subr.bf16.mxu0 %v612_v27 }
  0x57   :  { %571 = vmatpush3.bf16.msra.mxu1 %v649_v54 }
  0x58   :  { %572 = vmatprep.subr.bf16.mxu1 %v650_v55 }
  0x59   :  { %296 = vmatpush1.bf16.msra.mxu0 %v614_v30 }
  0x5a   :  { %297 = vmatprep.subr.bf16.mxu0 %v615_v31 }
  0x5b   :  { %573 = vmatpush3.bf16.msra.mxu1 %v651_v56 }
  0x5d   :  { %298 = vmatpush1.bf16.msra.mxu0 %v617_v32 }
  0x5e   :  { %299 = vmatprep.subr.bf16.mxu0 %v618_v35 }
  0x61   :  { %300 = vmatpush1.bf16.msra.mxu0 %v620_v38 }
  0x62   :  { %301 = vmatprep.subr.bf16.mxu0 %v621_v39 }
  0x65   :  { %302 = vmatpush1.bf16.msra.mxu0 %v623_v41 }
  0x66   :  { %303 = vmatprep.subr.bf16.mxu0 %v624_v42 }
  0x69   :  { %304 = vmatpush1.bf16.msra.mxu0 %v626_v43 }
  0x6a   :  { %305 = vmatprep.subr.bf16.mxu0 %v627_v44 }
  0x6d   :  { %306 = vmatpush1.bf16.msra.mxu0 %v629_v45 }
  0x6e   :  { %307 = vmatprep.subr.bf16.mxu0 %v630_v46 }
  0x71   :  { %308 = vmatpush1.bf16.msra.mxu0 %v632_v48 }
  0x72   :  { %309 = vmatprep.subr.bf16.mxu0 %v633_v49 }
  0x75   :  { %310 = vmatpush1.bf16.msra.mxu0 %v635_v51 }
  0x78   :  { %312 = vmatmul.mubr.bf16.vlgmr.msra.gmra.mrb[0].mxu0 %v73_v52 }
 0x14b   :  { %v313_v60 = vpop.f32.mrb[0].mxu0 }
 0x14c   :  { %v314_v61 = vadd.f32 %v313_v60, %v272_v58  ;;  %v315_v62 = vpop.f32.mrb[1].mxu0 }
 0x14d   :  { %v316_v63 = vadd.f32 %v315_v62, %v276_v59  ;;  %v317_v0 = vpop.f32.mrb[2].mxu0 }
 0x14e   :  { %v320_v1 = vmax.f32 %v314_v61, 0.0  ;;  %v318_v2 = vpop.f32.mrb[3].mxu0 }
 0x14f   :  { %v321_v3 = vmax.f32 %v316_v63, 0.0 }
 0x150   :  { %v322_v5 = vpack.c.bf16 %v320_v1, %v320_v1 }
 0x151   :  { %v323_v4 = vpack.c.bf16 %v321_v3, %v321_v3 }
 0x153   :  { %485 = vmatprep.mubr.bf16.mxu1 %v323_v4 }
 0x154   :  { %486 = vmatmul.mubr.bf16.vlgmr.msra.gmra.mrb[0].mxu1 %v322_v5 }
 0x227   :  { %v574_v6 = vpop.f32.mrb[0].mxu1 }
 0x228   :  { %v575_v8 = vpop.f32.mrb[1].mxu1 }
 0x229   :  { %v576_v9 = vadd.f32 %v575_v8, %v574_v6  ;;  %v577_v10 = vpop.f32.mrb[2].mxu1 }
 0x22a   :  { %v578_v11 = vpop.f32.mrb[3].mxu1 }
 0x22b   :  { %v488_v12 = vadd.f32 %v576_v9, %v356_v7 }
 0x22d   :  { %493 = vst [vmem:[#allocation8] sm:$0x1] %v488_v12 }
 0x22e   :  { %729 = shalt.err (!%p726_p0)
}
 0x22f   :  { %s730_s4 = scalar_lea.hbm %s855_s5, 16 }
 0x230   :  { %p731_p1 = scmp.ne.s32.totalorder %s855_s5, %s730_s4  ;;  %p734_p2 = scmp.lt.u32.totalorder %s730_s4, %s855_s5 }
 0x232   :  { %p736_p3 = pnand %p734_p2, %p731_p1 }
 0x234   :  { %739 = shalt.err (!%p736_p3)
}
 0x235   :  { %503 = dma.vmem_to_hbm [thread:$0]  %s501_s9, 16, %s855_s5, [#allocation4]  }
 0x236   :  { %744 = dma.done.wait [#allocation4], 16  }
 0x237   :  { %745 = vsyncadd [#allocation4], 4294967280 }
 0x238   :  { %507 = vsyncpa [#allocation3], 1 }
 0x239   :  { %508 = vsyncpa [#allocation6], 1 }
 0x23a   :  { %509 = vsyncpa [#allocation4], 1 }

</bundles_post_ra>
